<compile_context>
chip_gen: v7x
topology: tpu7x:2x2x1
jax: 0.10.0
libtpu: 0.0.40
codegen_flags: <defaults>
</compile_context>

<pallas_src>
import functools

import jax
import jax.numpy as jnp
from jax.experimental import pallas as pl
from jax.experimental.pallas import tpu as pltpu


def _round_up(x, m):
    return ((x + m - 1) // m) * m


def _pad2d(a, rows, cols, value=0.0):
    r, c = a.shape
    return jnp.pad(a, ((0, rows - r), (0, cols - c)), constant_values=value)


def _choose_batch_tile(B, batch_tile):
    # Balanced tiles: waste < 8 rows per tile instead of up to TB-1 rows.
    n = max(1, -(-B // batch_tile))
    # v7x has 2 TensorCores; split a large single-tile batch into 2 parallel
    # grid steps so both cores get work (one extra ~0.35us step on v5e/v6e).
    if n == 1 and B > 256:
        n = 2
    TB = _round_up(-(-B // n), 8)
    Bp = _round_up(B, TB)
    return TB, Bp


def actor_kernel(x_ref, w1_ref, b1_ref, w2_ref, b2_ref, out_ref):
    # Layer 1: Linear + ReLU. bf16 operands, f32 MXU accumulation. Padded
    # hidden lanes of W1/b1 are zero, so h is exactly zero there.
    x = x_ref[...].astype(jnp.bfloat16)
    h = jnp.dot(x, w1_ref[...], preferred_element_type=jnp.float32) + b1_ref[...]
    h = jnp.maximum(h, 0.0)

    # Layer 2: Linear. Padded hidden rows of W2 see h==0; padded action lanes
    # get 0 + b2_pad(-1e30), so the mask is already baked into the bias.
    logits = jnp.dot(h.astype(jnp.bfloat16), w2_ref[...],
                     preferred_element_type=jnp.float32) + b2_ref[...]

    # Numerically stable softmax over the lane-dense last axis (f32).
    m = jnp.max(logits, axis=-1, keepdims=True)
    e = jnp.exp(logits - m)            # exp(-1e30 - m) == 0 on padded lanes
    denom = jnp.sum(e, axis=-1, keepdims=True)
    # Exact reciprocal keeps the sum-to-1 invariant tight at 1e-5.
    out_ref[...] = (e * pl.reciprocal(denom, approx=False)).astype(out_ref.dtype)


def prepare_params(w1, b1, w2, b2):
    """One-time padding / casting of the Actor parameters (hoisted out of the
    per-call forward path)."""
    S, H = w1.shape
    A = w2.shape[1]
    Hp = _round_up(H, 128)
    Ap = _round_up(A, 128)

    w1p = _pad2d(w1.astype(jnp.float32), S, Hp).astype(jnp.bfloat16)
    b1p = _pad2d(b1.reshape(1, -1).astype(jnp.float32), 1, Hp)
    w2p = _pad2d(w2.astype(jnp.float32), Hp, Ap).astype(jnp.bfloat16)
    # Bake the softmax mask into the bias: padded action lanes get a large
    # finite negative so exp() zeroes them; no in-kernel iota/select needed.
    b2p = _pad2d(b2.reshape(1, -1).astype(jnp.float32), 1, Ap, value=-1e30)
    return w1p, b1p, w2p, b2p


@functools.partial(jax.jit, static_argnames=("action_dim", "batch_tile"))
def actor_forward(x, w1p, b1p, w2p, b2p, *, action_dim, batch_tile=512):
    B, S = x.shape
    Hp = w1p.shape[1]
    Ap = w2p.shape[1]

    TB, Bp = _choose_batch_tile(B, batch_tile)

    x = x.astype(jnp.float32)
    if Bp != B:
        # Only the batch dim ever gets padded; feature dim stays as-is.
        x = jnp.pad(x, ((0, Bp - B), (0, 0)))

    out = pl.pallas_call(
        actor_kernel,
        out_shape=jax.ShapeDtypeStruct((Bp, Ap), jnp.float32),
        grid=(Bp // TB,),
        in_specs=[
            # x streams per batch tile; last dim == full array dim (no lane pad).
            pl.BlockSpec((TB, S), lambda i: (i, 0)),
            # Weights/biases: constant index_map -> resident in VMEM across all
            # grid steps (no re-DMA per batch tile).
            # TODO(synk): for very large hidden sizes on v7x, add
            # pipeline_mode=pl.Buffered(1) here to avoid double-buffering.
            pl.BlockSpec((S, Hp), lambda i: (0, 0)),
            pl.BlockSpec((1, Hp), lambda i: (0, 0)),
            pl.BlockSpec((Hp, Ap), lambda i: (0, 0)),
            pl.BlockSpec((1, Ap), lambda i: (0, 0)),
        ],
        out_specs=pl.BlockSpec((TB, Ap), lambda i: (i, 0)),
        compiler_params=pltpu.CompilerParams(
            # Batch axis is embarrassingly parallel (megacore on v7x).
            dimension_semantics=("parallel",)),
    )(x, w1p, b1p, w2p, b2p)

    # Slice away batch / action padding outside the kernel.
    return out[:B, :action_dim]


def init_params(key, state_dim, action_dim, hidden_dim):
    # Deterministic synthetic init (PyTorch-style uniform bounds), f32.
    k1, k2, k3, k4 = jax.random.split(key, 4)
    bound1 = 1.0 / jnp.sqrt(state_dim)
    bound2 = 1.0 / jnp.sqrt(hidden_dim)
    w1 = jax.random.uniform(k1, (state_dim, hidden_dim), jnp.float32, -bound1, bound1)
    b1 = jax.random.uniform(k2, (1, hidden_dim), jnp.float32, -bound1, bound1)
    w2 = jax.random.uniform(k3, (hidden_dim, action_dim), jnp.float32, -bound2, bound2)
    b2 = jax.random.uniform(k4, (1, action_dim), jnp.float32, -bound2, bound2)
    return w1, b1, w2, b2


if __name__ == "__main__":
    state_dim, action_dim, hidden_dim = 4, 4, 32
    batch = 8

    key = jax.random.PRNGKey(0)
    kx, kp = jax.random.split(key)
    x = jax.random.normal(kx, (batch, state_dim), jnp.float32)
    w1, b1, w2, b2 = init_params(kp, state_dim, action_dim, hidden_dim)

    # One-time parameter preparation (padding + bf16 cast), then forward.
    w1p, b1p, w2p, b2p = prepare_params(w1, b1, w2, b2)
    probs = actor_forward(x, w1p, b1p, w2p, b2p, action_dim=action_dim)
    jax.block_until_ready(probs)

    # Reference mirroring the kernel's math (bf16 matmul operands, f32 accum).
    h_ref = jnp.maximum(
        jnp.dot(x.astype(jnp.bfloat16), w1.astype(jnp.bfloat16),
                preferred_element_type=jnp.float32) + b1, 0.0)
    logits_ref = jnp.dot(h_ref.astype(jnp.bfloat16), w2.astype(jnp.bfloat16),
                         preferred_element_type=jnp.float32) + b2
    probs_ref = jax.nn.softmax(logits_ref, axis=-1)

    # Full-f32 reference (PyTorch-equivalent math) for a sanity bound.
    probs_f32 = jax.nn.softmax(jnp.maximum(x @ w1 + b1, 0.0) @ w2 + b2, axis=-1)

    assert probs.shape == (batch, action_dim)
    assert jnp.allclose(probs, probs_ref, atol=1e-5, rtol=1e-5)
    assert jnp.allclose(jnp.sum(probs, axis=-1), 1.0, atol=1e-5)
    assert jnp.allclose(probs, probs_f32, atol=5e-2)

    print("KERNEL_OK")
</pallas_src>

<mosaic_0001>
module attributes {stable_mosaic.version = 11 : i64} {
  func.func @actor_kernel(%arg0: i32, %arg1: memref<8x4xf32, #tpu.memory_space<vmem>>, %arg2: memref<4x128xbf16, #tpu.memory_space<vmem>>, %arg3: memref<1x128xf32, #tpu.memory_space<vmem>>, %arg4: memref<128x128xbf16, #tpu.memory_space<vmem>>, %arg5: memref<1x128xf32, #tpu.memory_space<vmem>>, %arg6: memref<8x128xf32, #tpu.memory_space<vmem>>) attributes {dimension_semantics = [#tpu.dimension_semantics<parallel>], iteration_bounds = array<i64: 1>, scalar_prefetch = 0 : i64, scratch_operands = 0 : i64, tpu.core_type = #tpu.core_type<tc>, window_params = [{transform_indices = @transform_0, window_bounds = array<i64: 8, 4>}, {pipeline_mode = #tpu.pipeline_mode<synchronous>, transform_indices = @transform_1, window_bounds = array<i64: 4, 128>}, {pipeline_mode = #tpu.pipeline_mode<synchronous>, transform_indices = @transform_2, window_bounds = array<i64: 1, 128>}, {pipeline_mode = #tpu.pipeline_mode<synchronous>, transform_indices = @transform_3, window_bounds = array<i64: 128, 128>}, {pipeline_mode = #tpu.pipeline_mode<synchronous>, transform_indices = @transform_4, window_bounds = array<i64: 1, 128>}, {transform_indices = @transform_5, window_bounds = array<i64: 8, 128>}]} {
    %c0 = arith.constant 0 : index
    %c0_0 = arith.constant 0 : index
    %0 = vector.load %arg1[%c0, %c0_0] : memref<8x4xf32, #tpu.memory_space<vmem>>, vector<8x4xf32>
    %1 = arith.truncf %0 : vector<8x4xf32> to vector<8x4xbf16>
    %c0_1 = arith.constant 0 : index
    %c0_2 = arith.constant 0 : index
    %2 = vector.load %arg2[%c0_1, %c0_2] : memref<4x128xbf16, #tpu.memory_space<vmem>>, vector<4x128xbf16>
    %cst = arith.constant dense<0.000000e+00> : vector<8x128xf32>
    %3 = tpu.matmul %1, %2, %cst {dimension_numbers = #tpu.dot_dimension_numbers<[1], [0], [0], [1], [0, 0, 1, 1], [], []>} : vector<8x4xbf16>, vector<4x128xbf16>, vector<8x128xf32> -> vector<8x128xf32>
    %c0_3 = arith.constant 0 : index
    %c0_4 = arith.constant 0 : index
    %4 = vector.load %arg3[%c0_3, %c0_4] : memref<1x128xf32, #tpu.memory_space<vmem>>, vector<1x128xf32>
    %5 = vector.broadcast %4 : vector<1x128xf32> to vector<8x128xf32>
    %6 = arith.addf %3, %5 : vector<8x128xf32>
    %cst_5 = arith.constant 0.000000e+00 : f32
    %7 = vector.broadcast %cst_5 : f32 to vector<8x128xf32>
    %8 = arith.maximumf %6, %7 : vector<8x128xf32>
    %9 = arith.truncf %8 : vector<8x128xf32> to vector<8x128xbf16>
    %c0_6 = arith.constant 0 : index
    %c0_7 = arith.constant 0 : index
    %10 = vector.load %arg4[%c0_6, %c0_7] : memref<128x128xbf16, #tpu.memory_space<vmem>>, vector<128x128xbf16>
    %cst_8 = arith.constant dense<0.000000e+00> : vector<8x128xf32>
    %11 = tpu.matmul %9, %10, %cst_8 {dimension_numbers = #tpu.dot_dimension_numbers<[1], [0], [0], [1], [0, 0, 1, 1], [], []>} : vector<8x128xbf16>, vector<128x128xbf16>, vector<8x128xf32> -> vector<8x128xf32>
    %c0_9 = arith.constant 0 : index
    %c0_10 = arith.constant 0 : index
    %12 = vector.load %arg5[%c0_9, %c0_10] : memref<1x128xf32, #tpu.memory_space<vmem>>, vector<1x128xf32>
    %13 = vector.broadcast %12 : vector<1x128xf32> to vector<8x128xf32>
    %14 = arith.addf %11, %13 : vector<8x128xf32>
    %cst_11 = arith.constant dense<0xFF800000> : vector<8xf32>
    %15 = vector.multi_reduction <maximumf>, %14, %cst_11 [1] : vector<8x128xf32> to vector<8xf32>
    %16 = vector.shape_cast %15 : vector<8xf32> to vector<8x1xf32>
    %17 = vector.broadcast %16 : vector<8x1xf32> to vector<8x128xf32>
    %18 = arith.subf %14, %17 : vector<8x128xf32>
    %19 = math.exp %18 : vector<8x128xf32>
    %cst_12 = arith.constant dense<0.000000e+00> : vector<8xf32>
    %20 = vector.multi_reduction <add>, %19, %cst_12 [1] : vector<8x128xf32> to vector<8xf32>
    %21 = vector.shape_cast %20 : vector<8xf32> to vector<8x1xf32>
    %22 = tpu.reciprocal %21 : vector<8x1xf32> -> vector<8x1xf32>
    %23 = vector.broadcast %22 : vector<8x1xf32> to vector<8x128xf32>
    %24 = arith.mulf %19, %23 : vector<8x128xf32>
    %c0_13 = arith.constant 0 : index
    %c0_14 = arith.constant 0 : index
    %25 = vector.load %arg6[%c0_13, %c0_14] : memref<8x128xf32, #tpu.memory_space<vmem>>, vector<8x128xf32>
    tpu.vector_store %arg6[%c0_13, %c0_14], %24 {strides = array<i32>} : memref<8x128xf32, #tpu.memory_space<vmem>>, vector<8x128xf32>,
    return
  }
  func.func @transform_0(%arg0: i32) -> (i32, i32) {
    %c0_i32 = arith.constant 0 : i32
    %c0_i32_0 = arith.constant 0 : i32
    return %arg0, %c0_i32 : i32, i32
  }
  func.func @transform_1(%arg0: i32) -> (i32, i32) {
    %c0_i32 = arith.constant 0 : i32
    %c0_i32_0 = arith.constant 0 : i32
    %c0_i32_1 = arith.constant 0 : i32
    return %c0_i32, %c0_i32_0 : i32, i32
  }
  func.func @transform_2(%arg0: i32) -> (i32, i32) {
    %c0_i32 = arith.constant 0 : i32
    %c0_i32_0 = arith.constant 0 : i32
    %c0_i32_1 = arith.constant 0 : i32
    return %c0_i32, %c0_i32_0 : i32, i32
  }
  func.func @transform_3(%arg0: i32) -> (i32, i32) {
    %c0_i32 = arith.constant 0 : i32
    %c0_i32_0 = arith.constant 0 : i32
    %c0_i32_1 = arith.constant 0 : i32
    return %c0_i32, %c0_i32_0 : i32, i32
  }
  func.func @transform_4(%arg0: i32) -> (i32, i32) {
    %c0_i32 = arith.constant 0 : i32
    %c0_i32_0 = arith.constant 0 : i32
    %c0_i32_1 = arith.constant 0 : i32
    return %c0_i32, %c0_i32_0 : i32, i32
  }
  func.func @transform_5(%arg0: i32) -> (i32, i32) {
    %c0_i32 = arith.constant 0 : i32
    %c0_i32_0 = arith.constant 0 : i32
    return %arg0, %c0_i32 : i32, i32
  }
}

</mosaic_0001>

<bundles_post_ra>
// kernel: actor_forward.1
= control target key start
LH: loop header
LB: loop body
LE: loop exit
PB: predicated region body
PF: predicated region fallthrough
CT: control target
= control target key end

     0   :  { %10 = vsyncpa [#allocation3], 0  ;;  %s310_s18 = smov [#allocation2]   ;;  %s372_s0 = inlined_call_operand.vmem [shape: f32[8,4], index: 0, kind: input, shape index: {}]   ;;  %s373_s1 = inlined_call_operand.vmem [shape: bf16[4,128], index: 1, kind: input, shape index: {}]   ;;  %s374_s2 = inlined_call_operand.vmem [shape: f32[1,128], index: 2, kind: input, shape index: {}]   ;;  %s375_s3 = inlined_call_operand.hbm [shape: bf16[128,128], index: 3, kind: input, shape index: {}]   ;;  %s376_s4 = inlined_call_operand.vmem [shape: f32[1,128], index: 4, kind: input, shape index: {}]   ;;  %s377_s5 = inlined_call_operand.vmem [shape: f32[8,128], index: 5, kind: output, shape index: {}]  }
   0x1   :  { %s22_s19 = sshll.u32 %s310_s18, 4  ;;  %s286_s22 = scalar_lea.hbm %s375_s3, 1024  ;;  %s23_s19 = int_to_ptr.vmem [resolvable:$true] %s22_s19 }
   0x2   :  { %p287_p0 = scmp.ne.s32.totalorder %s375_s3, %s286_s22  ;;  %p290_p1 = scmp.lt.u32.totalorder %s286_s22, %s375_s3 }
   0x4   :  { %p292_p2 = pnand %p290_p1, %p287_p0 }
   0x6   :  { %295 = shalt.err (!%p292_p2)
}
   0x7   :  { %s296_s27 = scalar_lea.vmem %s23_s19, 1024  ;;  %p301_p4 = scmp.lt.s32.totalorder %s23_s19, %s23_s19 }
   0x8   :  { %p297_p3 = scmp.ne.s32.totalorder %s23_s19, %s296_s27  ;;  %p302_p5 = scmp.lt.s32.totalorder %s296_s27, %s296_s27 }
   0xa   :  { %p303_p6 = por %p302_p5, %p301_p4 }
   0xc   :  { %p304_p7 = pnand %p303_p6, %p297_p3 }
   0xe   :  { %307 = shalt.err (!%p304_p7)
}
   0xf   :  { %s311_s28 = smov 64   ;;  %s312_s29 = smov 4  }
  0x10   :  { %28 = dma.hbm_to_vmem [thread:$0]  %s375_s3, 1024, %s23_s19, [#allocation3], %s311_s28, %s311_s28, %s312_s29  }
  0x11   :  { %308 = dma.done.wait [#allocation3], 1024  }
  0x12   :  { %309 = vsyncadd [#allocation3], 4294966272  ;;  %v313_v0 = vmov 0.0   ;;  %vm314_vm0 = vmmov 0   ;;  %vm49_vm1 = vcmask 1041408   ;;  %v35_v2 = vld [vmem:[%s372_s0] sm:$0xff] }
  0x13   :  { %243 = vmatprep.subr.bf16.mxu0 %v313_v0  ;;  %245 = vmatprep.mubr.msk.bf16.mxu0 %vm314_vm0, %v313_v0  ;;  %v37_v1 = vld [vmem:[%s373_s1] sm:$0x3]  ;;  %v36_v4 = vpack.c.bf16 %v35_v2, %v35_v2  ;;  %vm45_vm2 = vcmask 31744   ;;  %v275_v6 = vld [vmem:[#allocation2 + $0x8] sm:$0xff]   ;;  %v276_v7 = vld [vmem:[#allocation2 + $0x10] sm:$0xff]  }
  0x14   :  { %249 = vmatprep.subr.bf16.mxu1 %v313_v0  ;;  %265 = vmatprep.mubr.msk.bf16.mxu1 %vm314_vm0, %v313_v0  ;;  %v51_v3 = vsel %vm49_vm1, %v37_v1, 0  ;;  %v274_v5 = vld [vmem:[#allocation2] sm:$0xff]   ;;  %v277_v8 = vld [vmem:[#allocation2 + $0x18] sm:$0xff]   ;;  %v279_v10 = vld [vmem:[#allocation2 + $0x28] sm:$0xff]  }
  0x15   :  { %244 = vmatpush3.bf16.msra.mxu0 %v51_v3  ;;  %250 = vmatpush3.bf16.msra.mxu1 %v274_v5  ;;  %v278_v9 = vld [vmem:[#allocation2 + $0x20] sm:$0xff]   ;;  %v280_v11 = vld [vmem:[#allocation2 + $0x30] sm:$0xff]   ;;  %v281_v12 = vld [vmem:[#allocation2 + $0x38] sm:$0xff]  }
  0x16   :  { %251 = vmatprep.subr.bf16.mxu1 %v313_v0  ;;  %v221_v13 = vld [vmem:[%s374_s2] ss:$0 sm:$0xff] }
  0x17   :  { %v223_v21 = vld [vmem:[%s376_s4] ss:$0 sm:$0xff] }
  0x18   :  { %246 = vmatmul.mubr.msk.bf16.vlgmr.msra.gmra.mrb[0].mxu0 %vm45_vm2, %v36_v4 }
  0x19   :  { %252 = vmatpush3.bf16.msra.mxu1 %v275_v6 }
  0x1a   :  { %253 = vmatprep.subr.bf16.mxu1 %v313_v0 }
  0x1d   :  { %254 = vmatpush3.bf16.msra.mxu1 %v276_v7 }
  0x1e   :  { %255 = vmatprep.subr.bf16.mxu1 %v313_v0 }
  0x21   :  { %256 = vmatpush3.bf16.msra.mxu1 %v277_v8 }
  0x22   :  { %257 = vmatprep.subr.bf16.mxu1 %v313_v0 }
  0x25   :  { %258 = vmatpush3.bf16.msra.mxu1 %v278_v9 }
  0x26   :  { %259 = vmatprep.subr.bf16.mxu1 %v313_v0 }
  0x29   :  { %260 = vmatpush3.bf16.msra.mxu1 %v279_v10 }
  0x2a   :  { %261 = vmatprep.subr.bf16.mxu1 %v313_v0 }
  0x2d   :  { %262 = vmatpush3.bf16.msra.mxu1 %v280_v11 }
  0x2e   :  { %263 = vmatprep.subr.bf16.mxu1 %v313_v0 }
  0x31   :  { %264 = vmatpush3.bf16.msra.mxu1 %v281_v12 }
  0xeb   :  { %v87_v14 = vpop.f32.mrb[0].mxu0 }
  0xec   :  { %v88_v15 = vadd.f32 %v221_v13, %v87_v14  ;;  %v247_v16 = vpop.f32.mrb[1].mxu0 }
  0xed   :  { %v90_v17 = vpop.f32.mrb[2].mxu0 }
  0xee   :  { %v93_v18 = vmax.f32 %v88_v15, 0.0  ;;  %v248_v19 = vpop.f32.mrb[3].mxu0 }
  0xf0   :  { %v94_v20 = vpack.c.bf16 %v93_v18, %v93_v18 }
  0xf2   :  { %266 = vmatmul.mubr.bf16.vlgmr.msra.gmra.mrb[0].mxu1 %v94_v20 }
 0x1c5   :  { %v200_v22 = vpop.f32.mrb[0].mxu1 }
 0x1c6   :  { %v201_v23 = vadd.f32 %v223_v21, %v200_v22  ;;  %v267_v24 = vpop.f32.mrb[1].mxu1 }
 0x1c7   :  { %v203_v25 = vpop.f32.mrb[2].mxu1 }
 0x1c8   :  { %206 = vmax.xlane.f32.xlu0 %v201_v23  ;;  %v268_v26 = vpop.f32.mrb[3].mxu1 }
 0x255   :  { %v207_v27 = vpop.xlane.xlu0 %206 }
 0x256   :  { %v208_v28 = vsub.f32 %v201_v23, %v207_v27 }
 0x258   :  { %v209_v29 = vmul.f32 1.442695, %v208_v28 }
 0x25a   :  { %282 = vpow2.f32 %v209_v29 }
 0x264   :  { %v283_v30 = vpop.eup %282 }
 0x265   :  { %211 = vadd.xlane.f32.xlu0 %v283_v30 }
 0x2f2   :  { %v212_v31 = vpop.xlane.xlu0 %211 }
 0x2f3   :  { %284 = vrcp.f32 %v212_v31 }
 0x2fd   :  { %v285_v32 = vpop.eup %284 }
 0x2fe   :  { %v214_v33 = vmul.f32 %v285_v32, %v283_v30 }
 0x300   :  { %215 = vst [vmem:[%s377_s5] sm:$0xff] %v214_v33 }
 0x301   :  { %220 = vsyncpa [#allocation3], 1 }

</bundles_post_ra>
